<compile_context>
chip_gen: v7x
topology: tpu7x:2x2x1
jax: 0.10.0
libtpu: 0.0.40
codegen_flags: <defaults>
</compile_context>

<pallas_src>
import numpy as np
import jax
import jax.numpy as jnp
from jax.experimental import pallas as pl
from jax.experimental.pallas import tpu as pltpu


# ----------------------------- Pallas kernel ------------------------------ #
def backbone_kernel(patches_ref, w1_ref, b1_ref, w2_ref, b2_ref, out_ref):
    # One grid step = one batch element; full spatial extent resident in VMEM.
    x = patches_ref[0]                                        # (HW, CK) bf16

    # stem conv as im2col matmul (BN scale pre-folded into w1), f32 accumulation
    h = jnp.dot(x, w1_ref[...], preferred_element_type=jnp.float32)
    h = h + b1_ref[...]                                       # folded BN bias (f32)
    h = h * jax.nn.sigmoid(h)                                 # SiLU (EUP, f32)

    # head 1x1 conv (BN scale pre-folded into w2)
    g = jnp.dot(h.astype(jnp.bfloat16), w2_ref[...],
                preferred_element_type=jnp.float32)
    g = g + b2_ref[...]                                       # folded BN bias (f32)
    g = g * jax.nn.sigmoid(g)                                 # SiLU

    # global average pool over spatial rows -- single shot, no accumulator
    out_ref[...] = jnp.mean(g, axis=0)[None, None, :]


# ------------------------------- glue (JAX) -------------------------------- #
def im2col_nchw(x, k=3, stride=2, pad=1):
    """(B, C, H, W) -> (B, Ho*Wo, C*k*k) row-major patches."""
    B, C, H, W = x.shape
    xp = jnp.pad(x, ((0, 0), (0, 0), (pad, pad), (pad, pad)))
    Ho = (H + 2 * pad - k) // stride + 1
    Wo = (W + 2 * pad - k) // stride + 1
    cols = []
    for i in range(k):
        for j in range(k):
            cols.append(xp[:, :, i:i + stride * Ho:stride, j:j + stride * Wo:stride])
    patches = jnp.stack(cols, axis=2)                     # (B, C, k*k, Ho, Wo)
    patches = patches.transpose(0, 3, 4, 1, 2)            # (B, Ho, Wo, C, k*k)
    return patches.reshape(B, Ho * Wo, C * k * k), Ho, Wo


def fold_bn(gamma, beta, mean, var, eps=1e-5):
    scale = gamma / jnp.sqrt(var + eps)
    bias = beta - mean * scale
    return scale[None, :], bias[None, :]


def init_params(key, c_in=4, c_mid=32, feat=128, k=3):
    ks = jax.random.split(key, 10)
    w1 = jax.random.normal(ks[0], (c_in * k * k, c_mid), jnp.float32) * 0.1
    g1 = 1.0 + 0.05 * jax.random.normal(ks[1], (c_mid,), jnp.float32)
    be1 = 0.05 * jax.random.normal(ks[2], (c_mid,), jnp.float32)
    mu1 = 0.05 * jax.random.normal(ks[3], (c_mid,), jnp.float32)
    var1 = jnp.abs(1.0 + 0.05 * jax.random.normal(ks[4], (c_mid,), jnp.float32))
    w2 = jax.random.normal(ks[5], (c_mid, feat), jnp.float32) * 0.1
    g2 = 1.0 + 0.05 * jax.random.normal(ks[6], (feat,), jnp.float32)
    be2 = 0.05 * jax.random.normal(ks[7], (feat,), jnp.float32)
    mu2 = 0.05 * jax.random.normal(ks[8], (feat,), jnp.float32)
    var2 = jnp.abs(1.0 + 0.05 * jax.random.normal(ks[9], (feat,), jnp.float32))
    s1, b1 = fold_bn(g1, be1, mu1, var1)
    s2, b2 = fold_bn(g2, be2, mu2, var2)
    return dict(w1=w1, s1=s1, b1=b1, w2=w2, s2=s2, b2=b2,
                feat=feat, c_mid=c_mid)


def prepare_backbone_params(params, cmid_pad=128):
    """Static, one-time weight prep: fold BN scale into weights, pad c_mid to a
    lane-aligned 128 (exact: padded channels contribute SiLU(0)=0 through zero
    w2 rows), cast MXU operands to bf16."""
    c_mid, F = params["c_mid"], params["feat"]
    w1f = params["w1"] * params["s1"]                     # fold scale into columns
    w2f = params["w2"] * params["s2"]
    w1p = jnp.pad(w1f, ((0, 0), (0, cmid_pad - c_mid)))   # (CK, 128)
    b1p = jnp.pad(params["b1"], ((0, 0), (0, cmid_pad - c_mid)))   # (1, 128) zeros
    w2p = jnp.pad(w2f, ((0, cmid_pad - c_mid), (0, 0)))   # (128, F) zero rows
    return dict(w1=w1p.astype(jnp.bfloat16),
                b1=b1p.astype(jnp.float32),
                w2=w2p.astype(jnp.bfloat16),
                b2=params["b2"].astype(jnp.float32),
                feat=F, cmid_pad=cmid_pad)


def deep_feature_forward(x_nchw, prep):
    """DeepFeatureLGBM.forward: returns flattened features (B, num_features)."""
    patches, Ho, Wo = im2col_nchw(x_nchw)                 # (B, HW, C*9) f32
    B, HW, CK = patches.shape
    F, CP = prep["feat"], prep["cmid_pad"]
    assert HW % 8 == 0, f"spatial size {HW} must be a multiple of 8"

    # bf16 MXU operands; no HBM-side K padding (Mosaic pads K in vregs).
    patches_bf = patches.astype(jnp.bfloat16)

    const = lambda b: (0, 0)  # weights/biases: DMA once, stay VMEM-resident
    grid_spec = pltpu.PrefetchScalarGridSpec(
        num_scalar_prefetch=0,
        grid=(B,),
        in_specs=[
            pl.BlockSpec((1, HW, CK), lambda b: (b, 0, 0)),   # patches (full HW)
            pl.BlockSpec((CK, CP), const),                    # w1 (scale folded)
            pl.BlockSpec((1, CP), const),                     # b1
            pl.BlockSpec((CP, F), const),                     # w2 (scale folded)
            pl.BlockSpec((1, F), const),                      # b2
        ],
        out_specs=pl.BlockSpec((1, 1, F), lambda b: (b, 0, 0)),
    )

    cost = pl.CostEstimate(
        flops=2 * B * HW * (CK * CP + CP * F),
        transcendentals=B * HW * (CP + F),                # two sigmoids (SiLU)
        bytes_accessed=(patches_bf.size * 2 + CK * CP * 2 + CP * F * 2
                        + CP * 4 + F * 4 + B * F * 4),
    )

    out = pl.pallas_call(
        backbone_kernel,
        out_shape=jax.ShapeDtypeStruct((B, 1, F), jnp.float32),
        grid_spec=grid_spec,
        compiler_params=pltpu.CompilerParams(
            # batch axis parallel -> both v7x TensorCores get work; v5e/v6e unaffected
            dimension_semantics=("parallel",),
            vmem_limit_bytes=32 * 1024 * 1024,   # actual footprint << 1 MiB
        ),
        cost_estimate=cost,
    )(patches_bf, prep["w1"], prep["b1"], prep["w2"], prep["b2"])

    return out.reshape(B, F)                     # Flatten -> (B, num_features)


def reference_forward(x_nchw, params):
    patches, Ho, Wo = im2col_nchw(x_nchw)        # (B, HW, C*9) f32
    h = patches @ params["w1"]
    h = h * params["s1"] + params["b1"]
    h = h * jax.nn.sigmoid(h)
    g = h @ params["w2"]
    g = g * params["s2"] + params["b2"]
    g = g * jax.nn.sigmoid(g)
    return jnp.mean(g, axis=1)                   # global average pool


if __name__ == "__main__":
    key = jax.random.PRNGKey(0)
    kx, kp = jax.random.split(key)
    x = jax.random.normal(kx, (2, 4, 16, 16), jnp.float32)   # NCHW like PyTorch
    params = init_params(kp, c_in=4, c_mid=32, feat=128)
    prep = prepare_backbone_params(params)                   # static weight prep

    feats = deep_feature_forward(x, prep)
    feats = jax.block_until_ready(feats)

    ref = reference_forward(x, params)
    # bf16 MXU operands with f32 accumulation -> relaxed tolerance vs f32 ref
    np.testing.assert_allclose(np.asarray(feats), np.asarray(ref),
                               rtol=2e-2, atol=2e-2)
    assert feats.shape == (2, 128)
    print("KERNEL_OK")
</pallas_src>

<mosaic_0001>
module attributes {stable_mosaic.version = 11 : i64} {
  func.func @backbone_kernel(%arg0: i32, %arg1: memref<1x64x36xbf16, #tpu.memory_space<vmem>>, %arg2: memref<36x128xbf16, #tpu.memory_space<vmem>>, %arg3: memref<1x128xf32, #tpu.memory_space<vmem>>, %arg4: memref<128x128xbf16, #tpu.memory_space<vmem>>, %arg5: memref<1x128xf32, #tpu.memory_space<vmem>>, %arg6: memref<1x1x128xf32, #tpu.memory_space<vmem>>) attributes {dimension_semantics = [#tpu.dimension_semantics<parallel>], iteration_bounds = array<i64: 2>, scalar_prefetch = 0 : i64, scratch_operands = 0 : i64, tpu.core_type = #tpu.core_type<tc>, window_params = [{transform_indices = @transform_0, window_bounds = array<i64: 1, 64, 36>}, {pipeline_mode = #tpu.pipeline_mode<synchronous>, transform_indices = @transform_1, window_bounds = array<i64: 36, 128>}, {pipeline_mode = #tpu.pipeline_mode<synchronous>, transform_indices = @transform_2, window_bounds = array<i64: 1, 128>}, {pipeline_mode = #tpu.pipeline_mode<synchronous>, transform_indices = @transform_3, window_bounds = array<i64: 128, 128>}, {pipeline_mode = #tpu.pipeline_mode<synchronous>, transform_indices = @transform_4, window_bounds = array<i64: 1, 128>}, {transform_indices = @transform_5, window_bounds = array<i64: 1, 1, 128>}]} {
    %c0 = arith.constant 0 : index
    %c0_0 = arith.constant 0 : index
    %c0_1 = arith.constant 0 : index
    %0 = vector.load %arg1[%c0, %c0_0, %c0_1] : memref<1x64x36xbf16, #tpu.memory_space<vmem>>, vector<1x64x36xbf16>
    %1 = vector.shape_cast %0 : vector<1x64x36xbf16> to vector<64x36xbf16>
    %c0_2 = arith.constant 0 : index
    %c0_3 = arith.constant 0 : index
    %2 = vector.load %arg2[%c0_2, %c0_3] : memref<36x128xbf16, #tpu.memory_space<vmem>>, vector<36x128xbf16>
    %cst = arith.constant dense<0.000000e+00> : vector<64x128xf32>
    %3 = tpu.matmul %1, %2, %cst {dimension_numbers = #tpu.dot_dimension_numbers<[1], [0], [0], [1], [0, 0, 1, 1], [], []>} : vector<64x36xbf16>, vector<36x128xbf16>, vector<64x128xf32> -> vector<64x128xf32>
    %c0_4 = arith.constant 0 : index
    %c0_5 = arith.constant 0 : index
    %4 = vector.load %arg3[%c0_4, %c0_5] : memref<1x128xf32, #tpu.memory_space<vmem>>, vector<1x128xf32>
    %5 = vector.broadcast %4 : vector<1x128xf32> to vector<64x128xf32>
    %6 = arith.addf %3, %5 : vector<64x128xf32>
    %7 = arith.negf %6 : vector<64x128xf32>
    %8 = math.exp %7 : vector<64x128xf32>
    %cst_6 = arith.constant 1.000000e+00 : f32
    %9 = vector.broadcast %cst_6 : f32 to vector<64x128xf32>
    %10 = arith.addf %9, %8 : vector<64x128xf32>
    %11 = arith.divf %9, %10 : vector<64x128xf32>
    %12 = arith.mulf %6, %11 : vector<64x128xf32>
    %13 = arith.truncf %12 : vector<64x128xf32> to vector<64x128xbf16>
    %c0_7 = arith.constant 0 : index
    %c0_8 = arith.constant 0 : index
    %14 = vector.load %arg4[%c0_7, %c0_8] : memref<128x128xbf16, #tpu.memory_space<vmem>>, vector<128x128xbf16>
    %cst_9 = arith.constant dense<0.000000e+00> : vector<64x128xf32>
    %15 = tpu.matmul %13, %14, %cst_9 {dimension_numbers = #tpu.dot_dimension_numbers<[1], [0], [0], [1], [0, 0, 1, 1], [], []>} : vector<64x128xbf16>, vector<128x128xbf16>, vector<64x128xf32> -> vector<64x128xf32>
    %c0_10 = arith.constant 0 : index
    %c0_11 = arith.constant 0 : index
    %16 = vector.load %arg5[%c0_10, %c0_11] : memref<1x128xf32, #tpu.memory_space<vmem>>, vector<1x128xf32>
    %17 = vector.broadcast %16 : vector<1x128xf32> to vector<64x128xf32>
    %18 = arith.addf %15, %17 : vector<64x128xf32>
    %19 = arith.negf %18 : vector<64x128xf32>
    %20 = math.exp %19 : vector<64x128xf32>
    %cst_12 = arith.constant 1.000000e+00 : f32
    %21 = vector.broadcast %cst_12 : f32 to vector<64x128xf32>
    %22 = arith.addf %21, %20 : vector<64x128xf32>
    %23 = arith.divf %21, %22 : vector<64x128xf32>
    %24 = arith.mulf %18, %23 : vector<64x128xf32>
    %cst_13 = arith.constant dense<0.000000e+00> : vector<128xf32>
    %25 = vector.multi_reduction <add>, %24, %cst_13 [0] : vector<64x128xf32> to vector<128xf32>
    %cst_14 = arith.constant 6.400000e+01 : f32
    %26 = vector.broadcast %cst_14 : f32 to vector<128xf32>
    %27 = arith.divf %25, %26 : vector<128xf32>
    %28 = vector.shape_cast %27 : vector<128xf32> to vector<1x1x128xf32>
    %c0_15 = arith.constant 0 : index
    %c0_16 = arith.constant 0 : index
    %c0_17 = arith.constant 0 : index
    %29 = vector.load %arg6[%c0_15, %c0_16, %c0_17] : memref<1x1x128xf32, #tpu.memory_space<vmem>>, vector<1x1x128xf32>
    tpu.vector_store %arg6[%c0_15, %c0_16, %c0_17], %28 {strides = array<i32>} : memref<1x1x128xf32, #tpu.memory_space<vmem>>, vector<1x1x128xf32>,
    return
  }
  func.func @transform_0(%arg0: i32) -> (i32, i32, i32) {
    %c0_i32 = arith.constant 0 : i32
    %c0_i32_0 = arith.constant 0 : i32
    %c0_i32_1 = arith.constant 0 : i32
    return %arg0, %c0_i32, %c0_i32_0 : i32, i32, i32
  }
  func.func @transform_1(%arg0: i32) -> (i32, i32) {
    %c0_i32 = arith.constant 0 : i32
    %c0_i32_0 = arith.constant 0 : i32
    %c0_i32_1 = arith.constant 0 : i32
    return %c0_i32, %c0_i32_0 : i32, i32
  }
  func.func @transform_2(%arg0: i32) -> (i32, i32) {
    %c0_i32 = arith.constant 0 : i32
    %c0_i32_0 = arith.constant 0 : i32
    %c0_i32_1 = arith.constant 0 : i32
    return %c0_i32, %c0_i32_0 : i32, i32
  }
  func.func @transform_3(%arg0: i32) -> (i32, i32) {
    %c0_i32 = arith.constant 0 : i32
    %c0_i32_0 = arith.constant 0 : i32
    %c0_i32_1 = arith.constant 0 : i32
    return %c0_i32, %c0_i32_0 : i32, i32
  }
  func.func @transform_4(%arg0: i32) -> (i32, i32) {
    %c0_i32 = arith.constant 0 : i32
    %c0_i32_0 = arith.constant 0 : i32
    %c0_i32_1 = arith.constant 0 : i32
    return %c0_i32, %c0_i32_0 : i32, i32
  }
  func.func @transform_5(%arg0: i32) -> (i32, i32, i32) {
    %c0_i32 = arith.constant 0 : i32
    %c0_i32_0 = arith.constant 0 : i32
    %c0_i32_1 = arith.constant 0 : i32
    return %arg0, %c0_i32, %c0_i32_0 : i32, i32, i32
  }
}

</mosaic_0001>

<bundles_post_ra>
// kernel: tpu_custom_call.1
= control target key start
LH: loop header
LB: loop body
LE: loop exit
PB: predicated region body
PF: predicated region fallthrough
CT: control target
= control target key end

     0   :  { %10 = vsyncpa [#allocation3], 0  ;;  %s1153_s0 = inlined_call_operand.vmem [shape: bf16[2,64,36], index: 0, kind: input, shape index: {}]   ;;  %s1154_s1 = inlined_call_operand.vmem [shape: bf16[36,128], index: 1, kind: input, shape index: {}]   ;;  %s1155_s2 = inlined_call_operand.vmem [shape: f32[1,128], index: 2, kind: input, shape index: {}]   ;;  %s1156_s3 = inlined_call_operand.vmem [shape: bf16[128,128], index: 3, kind: input, shape index: {}]   ;;  %s1157_s4 = inlined_call_operand.vmem [shape: f32[1,128], index: 4, kind: input, shape index: {}]   ;;  %s1158_s5 = inlined_call_operand.hbm [shape: f32[2,1,128], index: 5, kind: output, shape index: {}]  }
   0x1   :  { %12 = vsyncpa [#allocation3 + $0x1], 0  ;;  %s1014_s18 = smov 0   ;;  %s1016_s19 = smov 0  }
   0x2   :  { %s1018_s20 = smov 0   ;;  %s1020_s21 = smov 0  }
   0x3 LB: > { %s1035_s22 = sadd.s32 4294967295, %s981_s21   ;;  %s696_s23 = sadd.s32 4294967294, %s981_s21   ;;  %s981_s21 = sphi %s1020_s21, %s1164_s21   ;;  %s977_s20 = sphi %s1018_s20, %s1163_s20   ;;  %s973_s19 = sphi %s1016_s19, %s1162_s19   ;;  %s969_s18 = sphi %s1014_s18, %s1161_s18  }
   0x4   : > { %s1039_s24 = sadd.s32 1, %s981_s21   ;;  %s135_s25 = sadd.s32 1, %s977_s20 }
   0x5   : > { %s132_s26 = ssub.s32 %s981_s21, %s1039_s24  ;;  %p145_p0 = scmp.ne.s32.totalorder %s977_s20, %s973_s19 }
   0x6   : > { %p133_p1 = scmp.eq.s32.totalorder %s132_s26, 0  ;;  %p146_p2 = scmp.eq.s32.totalorder %s1035_s22, 1 }
   0x7   : > { %p151_p3 = scmp.ne.s32.totalorder %s973_s19, %s969_s18  ;;  %p152_p4 = scmp.eq.s32.totalorder %s696_s23, 1 }
   0x8   : > { %s1050_s27 = scalar_select %p133_p1, %s977_s20, %s135_s25  }
   0x9   : > { %p1052_p5 = por %p146_p2, %p145_p0  ;;  %p1056_p6 = por %p152_p4, %p151_p3 }
   0xa   : > { %p699_p7 = scmp.ge.s32.totalorder %s981_s21, 1  ;;  %p190_p8 = scmp.lt.s32.totalorder %s981_s21, 3 }
   0xc   : > { %p191_p9 = pnand %p699_p7, %p190_p8 }
   0xd   : > { %v840_v0 = vld [vmem:[%s1154_s1] sm:$0xff] (!%p191_p9)   ;;  %v841_v1 = vld [vmem:[%s1154_s1 + $0x8] sm:$0xff] (!%p191_p9)   ;;  %p217_p10 = scmp.lt.s32.totalorder (!%p191_p9), %s1035_s22, 1  ;;  %v842_v2 = vld [vmem:[%s1154_s1 + $0x10] ss:$0 sps:$4 sm:$0x33] (!%p191_p9)  }
   0xe   : > { %194 = sbr.rel (%p191_p9) target bundleno = 562 (0x232), region = 40  ;;  %762 = vmatprep.subr.bf16.mxu0 (!%p191_p9), %v840_v0  ;;  %vm291_vm0 = vcmask (!%p191_p9), 1041408   ;;  %vm278_vm1 = vcmask (!%p191_p9), 293888   ;;  %v847_v8 = vld [vmem:[%s1156_s3] sm:$0xff] (!%p191_p9)   ;;  %v848_v9 = vld [vmem:[%s1156_s3 + $0x8] sm:$0xff] (!%p191_p9)   ;;  %v849_v10 = vld [vmem:[%s1156_s3 + $0x10] sm:$0xff] (!%p191_p9)  }
   0xf   : > { %763 = vmatpush3.bf16.msra.mxu0 (!%p191_p9), %v840_v0  ;;  %v293_v4 = vsel (!%p191_p9), %vm291_vm0, %v842_v2, 0  ;;  %776 = vmatprep.subr.bf16.mxu1 (!%p191_p9), %v847_v8  ;;  %v850_v11 = vld [vmem:[%s1156_s3 + $0x18] sm:$0xff] (!%p191_p9)   ;;  %v851_v12 = vld [vmem:[%s1156_s3 + $0x20] sm:$0xff] (!%p191_p9)   ;;  %v852_v13 = vld [vmem:[%s1156_s3 + $0x28] sm:$0xff] (!%p191_p9)   ;;  %s215_s26 = sand.u32 (!%p191_p9), 1, %s973_s19   ;;  %s739_s30 = sshll.u32 (!%p191_p9), %s1035_s22, 4 }
  0x10   : > { %764 = vmatprep.subr.bf16.mxu0 (!%p191_p9), %v841_v1  ;;  %777 = vmatpush3.bf16.msra.mxu1 (!%p191_p9), %v847_v8  ;;  %v853_v14 = vld [vmem:[%s1156_s3 + $0x30] sm:$0xff] (!%p191_p9)   ;;  %v854_v15 = vld [vmem:[%s1156_s3 + $0x38] sm:$0xff] (!%p191_p9)   ;;  %v702_v16 = vld [vmem:[%s1155_s2] ss:$0 sm:$0xff] (!%p191_p9)  ;;  %s216_s6 = scalar_lea.vmem (!%p191_p9), [#allocation2], %s215_s26  ;;  %s1111_s10 = scalar_lea.hbm (!%p191_p9), %s1158_s5, %s739_s30 }
  0x11   : > { %778 = vmatprep.subr.bf16.mxu1 (!%p191_p9), %v848_v9  ;;  %s641_s7 = sshll.u32 (!%p191_p9), %s216_s6, 4  ;;  %s1113_s7 = int_to_ptr.vmem [resolvable:$true] %s641_s7 }
  0x13   : > { %765 = vmatpush3.bf16.msra.mxu0 (!%p191_p9), %v841_v1 }
  0x14   : > { %800 = vmatprep.subr.msk.bf16.mxu0 (!%p191_p9), %vm291_vm0, %v842_v2  ;;  %779 = vmatpush3.bf16.msra.mxu1 (!%p191_p9), %v848_v9 }
  0x15   : > { %s218_s11 = scalar_select %p217_p10, %s1035_s22, 1  ;;  %780 = vmatprep.subr.bf16.mxu1 %v849_v10 }
  0x16   : > { %s983_s22 = smov [#allocation2]  }
  0x17   : > { %s742_s12 = sshll.u32 %s218_s11, 5  ;;  %767 = vmatpush3.bf16.msra.mxu0 %v293_v4  ;;  %s629_s11 = scalar_lea.sflag [#allocation3], %s215_s26 }
  0x18   : > { %s221_s15 = scalar_lea.vmem %s1153_s0, %s742_s12  ;;  %781 = vmatpush3.bf16.msra.mxu1 %v849_v10  ;;  %s919_s12 = scalar_lea.vmem %s1113_s7, 16 }
  0x19   : > { %v843_v3 = vld [vmem:[%s221_s15] sm:$0xff]   ;;  %v844_v5 = vld [vmem:[%s221_s15 + $0x8] sm:$0xff]   ;;  %v845_v6 = vld [vmem:[%s221_s15 + $0x10] sm:$0xff]   ;;  %782 = vmatprep.subr.bf16.mxu1 %v850_v11  ;;  %p920_p11 = scmp.ne.s32.totalorder %s1113_s7, %s919_s12  ;;  %s923_s13 = sshll.u32 %s983_s22, 4  ;;  %s924_s13 = int_to_ptr.vmem [resolvable:$false] %s923_s13 }
  0x1a   : > { %768 = vmatprep.mubr.msk.bf16.mxu0 %vm278_vm1, %v843_v3  ;;  %v846_v7 = vld [vmem:[%s221_s15 + $0x18] sm:$0xff]   ;;  %s925_s14 = scalar_lea.vmem %s924_s13, 32  ;;  %p926_p0 = scmp.lt.s32.totalorder %s1113_s7, %s924_s13 }
  0x1b   : > { %769 = vmatmul.mubr.msk.bf16.vlgmr.msra.gmra.mrb[0].mxu0 %vm278_vm1, %v844_v5  ;;  %p921_p12 = pnand %p920_p11, %p1052_p5  ;;  %p927_p1 = scmp.lt.s32.totalorder %s925_s14, %s919_s12 }
  0x1c   : > { %772 = vmatprep.mubr.msk.bf16.mxu0 %vm278_vm1, %v845_v6  ;;  %783 = vmatpush3.bf16.msra.mxu1 %v850_v11 }
  0x1d   : > { %784 = vmatprep.subr.bf16.mxu1 %v851_v12  ;;  %p922_p13 = pneg %p921_p12  ;;  %p928_p2 = por %p927_p1, %p926_p0 }
  0x1f   : > { %p929_p3 = pnand %p928_p2, %p922_p13 }
  0x20   : > { %785 = vmatpush3.bf16.msra.mxu1 %v851_v12 }
  0x21   : > { %786 = vmatprep.subr.bf16.mxu1 %v852_v13 }
  0x23   : > { %773 = vmatmul.mubr.msk.bf16.gmra.mrb[4].mxu0 %vm278_vm1, %v846_v7 }
  0x24   : > { %787 = vmatpush3.bf16.msra.mxu1 %v852_v13  ;;  %v722_v13 = vld [vmem:[%s1157_s4] ss:$0 sm:$0xff] }
  0x25   : > { %788 = vmatprep.subr.bf16.mxu1 %v853_v14 }
  0x28   : > { %789 = vmatpush3.bf16.msra.mxu1 %v853_v14 }
  0x29   : > { %790 = vmatprep.subr.bf16.mxu1 %v854_v15 }
  0x2c   : > { %791 = vmatpush3.bf16.msra.mxu1 %v854_v15 }
  0xee   : > { %v770_v17 = vpop.f32.mrb[0].mxu0 }
  0xef   : > { %v338_v18 = vadd.f32 %v770_v17, %v702_v16  ;;  %v329_v19 = vpop.f32.mrb[1].mxu0 }
  0xf0   : > { %v330_v20 = vadd.f32 %v702_v16, %v329_v19  ;;  %v771_v21 = vpop.f32.mrb[2].mxu0 }
  0xf1   : > { %v716_v22 = vmul.f32 -1.442695, %v338_v18  ;;  %v341_v23 = vadd.f32 %v771_v21, %v702_v16  ;;  %v332_v24 = vpop.f32.mrb[3].mxu0 }
  0xf2   : > { %v714_v25 = vmul.f32 -1.442695, %v330_v20  ;;  %v333_v26 = vadd.f32 %v702_v16, %v332_v24 }
  0xf3   : > { %855 = vpow2.f32 %v716_v22  ;;  %v717_v27 = vmul.f32 -1.442695, %v341_v23 }
  0xf4   : > { %857 = vpow2.f32 %v714_v25  ;;  %v715_v28 = vmul.f32 -1.442695, %v333_v26 }
  0xf5   : > { %859 = vpow2.f32 %v717_v27 }
  0xf6   : > { %861 = vpow2.f32 %v715_v28  ;;  %v774_v29 = vpop.f32.mrb[4].mxu0 }
  0xf7   : > { %v354_v30 = vadd.f32 %v774_v29, %v702_v16  ;;  %v345_v31 = vpop.f32.mrb[5].mxu0 }
  0xf8   : > { %v346_v32 = vadd.f32 %v702_v16, %v345_v31  ;;  %v775_v33 = vpop.f32.mrb[6].mxu0 }
  0xf9   : > { %v720_v34 = vmul.f32 -1.442695, %v354_v30  ;;  %v357_v35 = vadd.f32 %v775_v33, %v702_v16  ;;  %v348_v36 = vpop.f32.mrb[7].mxu0 }
  0xfa   : > { %v718_v37 = vmul.f32 -1.442695, %v346_v32  ;;  %v349_v38 = vadd.f32 %v702_v16, %v348_v36 }
  0xfb   : > { %863 = vpow2.f32 %v720_v34  ;;  %v721_v39 = vmul.f32 -1.442695, %v357_v35 }
  0xfc   : > { %865 = vpow2.f32 %v718_v37  ;;  %v719_v40 = vmul.f32 -1.442695, %v349_v38 }
  0xfd   : > { %v856_v41 = vpop.eup %855  ;;  %867 = vpow2.f32 %v721_v39 }
  0xfe   : > { %v858_v42 = vpop.eup %857  ;;  %v386_v43 = vadd.f32 1.0, %v856_v41  ;;  %869 = vpow2.f32 %v719_v40 }
  0xff   : > { %v860_v44 = vpop.eup %859  ;;  %v384_v45 = vadd.f32 1.0, %v858_v42 }
 0x100   : > { %v862_v46 = vpop.eup %861  ;;  %871 = vrcp.f32 %v386_v43  ;;  %v387_v47 = vadd.f32 1.0, %v860_v44 }
 0x101   : > { %873 = vrcp.f32 %v384_v45  ;;  %v385_v48 = vadd.f32 1.0, %v862_v46 }
 0x102   : > { %875 = vrcp.f32 %v387_v47 }
 0x103   : > { %877 = vrcp.f32 %v385_v48 }
 0x105   : > { %v864_v49 = vpop.eup %863 }
 0x106   : > { %v866_v50 = vpop.eup %865  ;;  %v390_v51 = vadd.f32 1.0, %v864_v49 }
 0x107   : > { %v868_v52 = vpop.eup %867  ;;  %v388_v53 = vadd.f32 1.0, %v866_v50 }
 0x108   : > { %v870_v54 = vpop.eup %869  ;;  %879 = vrcp.f32 %v390_v51  ;;  %v391_v55 = vadd.f32 1.0, %v868_v52 }
 0x109   : > { %881 = vrcp.f32 %v388_v53  ;;  %v389_v56 = vadd.f32 1.0, %v870_v54 }
 0x10a   : > { %v872_v57 = vpop.eup %871  ;;  %883 = vrcp.f32 %v391_v55 }
 0x10b   : > { %v874_v58 = vpop.eup %873  ;;  %885 = vrcp.f32 %v389_v56  ;;  %v410_v61 = vmul.f32 %v872_v57, %v338_v18 }
 0x10c   : > { %v876_v59 = vpop.eup %875  ;;  %v408_v63 = vmul.f32 %v874_v58, %v330_v20 }
 0x10d   : > { %v878_v60 = vpop.eup %877  ;;  %v411_v62 = vmul.f32 %v876_v59, %v341_v23 }
 0x10e   : > { %v409_v0 = vmul.f32 %v878_v60, %v333_v26 }
 0x10f   : > { %v417_v1 = vpack.c.bf16 %v411_v62, %v410_v61 }
 0x110   : > { %v416_v2 = vpack.c.bf16 %v409_v0, %v408_v63 }
 0x112   : > { %v880_v3 = vpop.eup %879  ;;  %792 = vmatprep.mubr.bf16.mxu1 %v416_v2 }
 0x113   : > { %v882_v4 = vpop.eup %881  ;;  %793 = vmatmul.mubr.bf16.vlgmr.msra.gmra.mrb[0].mxu1 %v417_v1  ;;  %v414_v7 = vmul.f32 %v880_v3, %v354_v30 }
 0x114   : > { %v884_v5 = vpop.eup %883  ;;  %v412_v9 = vmul.f32 %v882_v4, %v346_v32 }
 0x115   : > { %v886_v6 = vpop.eup %885  ;;  %v415_v8 = vmul.f32 %v884_v5, %v357_v35 }
 0x116   : > { %v413_v10 = vmul.f32 %v886_v6, %v349_v38 }
 0x117   : > { %v419_v11 = vpack.c.bf16 %v415_v8, %v414_v7 }
 0x118   : > { %v418_v12 = vpack.c.bf16 %v413_v10, %v412_v9 }
 0x11a   : > { %796 = vmatprep.mubr.bf16.mxu1 %v418_v12 }
 0x11b   : > { %797 = vmatmul.mubr.bf16.gmra.mrb[4].mxu1 %v419_v11 }
 0x1e6   : > { %v794_v14 = vpop.f32.mrb[0].mxu1 }
 0x1e7   : > { %v534_v15 = vadd.f32 %v794_v14, %v722_v13  ;;  %v525_v16 = vpop.f32.mrb[1].mxu1 }
 0x1e8   : > { %v526_v17 = vadd.f32 %v722_v13, %v525_v16  ;;  %v795_v18 = vpop.f32.mrb[2].mxu1 }
 0x1e9   : > { %v733_v19 = vmul.f32 -1.442695, %v534_v15  ;;  %v537_v20 = vadd.f32 %v795_v18, %v722_v13  ;;  %v528_v21 = vpop.f32.mrb[3].mxu1 }
 0x1ea   : > { %v731_v22 = vmul.f32 -1.442695, %v526_v17  ;;  %v529_v23 = vadd.f32 %v722_v13, %v528_v21 }
 0x1eb   : > { %887 = vpow2.f32 %v733_v19  ;;  %v734_v24 = vmul.f32 -1.442695, %v537_v20 }
 0x1ec   : > { %889 = vpow2.f32 %v731_v22  ;;  %v732_v25 = vmul.f32 -1.442695, %v529_v23 }
 0x1ed   : > { %891 = vpow2.f32 %v734_v24 }
 0x1ee   : > { %893 = vpow2.f32 %v732_v25  ;;  %v798_v26 = vpop.f32.mrb[4].mxu1 }
 0x1ef   : > { %v550_v27 = vadd.f32 %v798_v26, %v722_v13  ;;  %v541_v28 = vpop.f32.mrb[5].mxu1 }
 0x1f0   : > { %v542_v29 = vadd.f32 %v722_v13, %v541_v28  ;;  %v799_v30 = vpop.f32.mrb[6].mxu1 }
 0x1f1   : > { %v737_v31 = vmul.f32 -1.442695, %v550_v27  ;;  %v553_v32 = vadd.f32 %v799_v30, %v722_v13  ;;  %v544_v33 = vpop.f32.mrb[7].mxu1 }
 0x1f2   : > { %v735_v34 = vmul.f32 -1.442695, %v542_v29  ;;  %v545_v35 = vadd.f32 %v722_v13, %v544_v33 }
 0x1f3   : > { %895 = vpow2.f32 %v737_v31  ;;  %v738_v36 = vmul.f32 -1.442695, %v553_v32 }
 0x1f4   : > { %897 = vpow2.f32 %v735_v34  ;;  %v736_v37 = vmul.f32 -1.442695, %v545_v35 }
 0x1f5   : > { %v888_v38 = vpop.eup %887  ;;  %899 = vpow2.f32 %v738_v36 }
 0x1f6   : > { %v890_v39 = vpop.eup %889  ;;  %v582_v40 = vadd.f32 1.0, %v888_v38  ;;  %901 = vpow2.f32 %v736_v37 }
 0x1f7   : > { %v892_v41 = vpop.eup %891  ;;  %v580_v42 = vadd.f32 1.0, %v890_v39 }
 0x1f8   : > { %v894_v43 = vpop.eup %893  ;;  %v583_v44 = vadd.f32 1.0, %v892_v41 }
 0x1f9   : > { %903 = vrcp.f32 %v580_v42  ;;  %v581_v45 = vadd.f32 1.0, %v894_v43 }
 0x1fa   : > { %905 = vrcp.f32 %v582_v40 }
 0x1fb   : > { %907 = vrcp.f32 %v581_v45 }
 0x1fc   : > { %909 = vrcp.f32 %v583_v44 }
 0x1fd   : > { %v896_v46 = vpop.eup %895 }
 0x1fe   : > { %v898_v47 = vpop.eup %897  ;;  %v586_v48 = vadd.f32 1.0, %v896_v46 }
 0x1ff   : > { %v900_v49 = vpop.eup %899  ;;  %v584_v50 = vadd.f32 1.0, %v898_v47 }
 0x200   : > { %v902_v51 = vpop.eup %901  ;;  %v587_v52 = vadd.f32 1.0, %v900_v49 }
 0x201   : > { %911 = vrcp.f32 %v584_v50  ;;  %v585_v53 = vadd.f32 1.0, %v902_v51 }
 0x202   : > { %913 = vrcp.f32 %v586_v48 }
 0x203   : > { %v904_v54 = vpop.eup %903  ;;  %915 = vrcp.f32 %v585_v53 }
 0x204   : > { %v906_v55 = vpop.eup %905  ;;  %917 = vrcp.f32 %v587_v52  ;;  %v604_v57 = vmul.f32 %v904_v54, %v526_v17 }
 0x205   : > { %v908_v56 = vpop.eup %907  ;;  %v606_v60 = vmul.f32 %v906_v55, %v534_v15 }
 0x206   : > { %v605_v58 = vmul.f32 %v908_v56, %v529_v23  ;;  %v910_v59 = vpop.eup %909 }
 0x207   : > { %v607_v62 = vmul.f32 %v910_v59, %v537_v20 }
 0x208   : > { %v612_v61 = vadd.f32 %v605_v58, %v604_v57 }
 0x20a   : > { %v613_v63 = vadd.f32 %v612_v61, %v606_v60 }
 0x20b   : > { %v912_v0 = vpop.eup %911 }
 0x20c   : > { %v914_v1 = vpop.eup %913  ;;  %v608_v2 = vmul.f32 %v912_v0, %v542_v29  ;;  %v614_v3 = vadd.f32 %v613_v63, %v607_v62 }
 0x20d   : > { %v916_v4 = vpop.eup %915  ;;  %v610_v8 = vmul.f32 %v914_v1, %v550_v27 }
 0x20e   : > { %v615_v5 = vadd.f32 %v614_v3, %v608_v2  ;;  %v609_v6 = vmul.f32 %v916_v4, %v545_v35  ;;  %v918_v7 = vpop.eup %917 }
 0x20f   : > { %v611_v10 = vmul.f32 %v918_v7, %v553_v32 }
 0x210   : > { %v616_v9 = vadd.f32 %v615_v5, %v609_v6 }
 0x212   : > { %v617_v11 = vadd.f32 %v616_v9, %v610_v8 }
 0x214   : > { %v618_v12 = vadd.f32 %v617_v11, %v611_v10 }
 0x216   : > { %v619_v13 = vrot.slane %v618_v12, 4 }
 0x218   : > { %v620_v14 = vadd.f32 %v619_v13, %v618_v12 }
 0x21a   : > { %v621_v15 = vrot.slane %v620_v14, 2 }
 0x21c   : > { %v622_v16 = vadd.f32 %v621_v15, %v620_v14 }
 0x21e   : > { %v623_v17 = vrot.slane %v622_v16, 1 }
 0x220   : > { %v624_v18 = vadd.f32 %v623_v17, %v622_v16 }
 0x222   : > { %v626_v19 = vmul.f32 0.015625, %v624_v18 }
 0x224   : > { %627 = vst [vmem:[%s216_s6] sm:$0x1] %v626_v19 }
 0x225   : > { %932 = shalt.err (!%p929_p3)
}
 0x226   : > { %s933_s15 = scalar_lea.hbm %s1111_s10, 16  ;;  %s937_s23 = scalar_lea.hbm %s1158_s5, 32 }
 0x227   : > { %p934_p4 = scmp.ne.s32.totalorder %s1111_s10, %s933_s15  ;;  %p938_p9 = scmp.lt.u32.totalorder %s1111_s10, %s1158_s5 }
 0x228   : > { %p939_p10 = scmp.lt.u32.totalorder %s937_s23, %s933_s15  ;;  %p941_p12 = scmp.lt.u32.totalorder %s933_s15, %s1111_s10 }
 0x229   : > { %p935_p7 = pnand %p934_p4, %p1052_p5 }
 0x22a   : > { %p940_p11 = por %p939_p10, %p938_p9 }
 0x22b   : > { %p936_p8 = pneg %p935_p7 }
 0x22c   : > { %p942_p13 = por %p941_p12, %p940_p11 }
 0x22e   : > { %p943_p0 = pnand %p942_p13, %p936_p8 }
 0x230   : > { %946 = shalt.err (!%p943_p0)
}
 0x231   : > { %801 = dma.vmem_to_hbm [thread:$0]  (%p1052_p5), %s1113_s7, 16, %s1111_s10, %s629_s11  }
 0x232 PF: > { %p807_p1 = scmp.ge.s32.totalorder %s981_s21, 2  ;;  %s653_s30 = sand.u32 1, %s969_s18  }
 0x233   : > { %s654_s6 = scalar_lea.sflag [#allocation3], %s653_s30 }
 0x234   : > { %p804_p2 = pnand %p807_p1, %p1056_p6 }
 0x236   : > { %964 = dma.done.wait (!%p804_p2), %s654_s6, 16  }
 0x237   : > { %966 = vsyncadd (!%p804_p2), %s654_s6, 4294967280  ;;  %p15_p3 = scmp.ge.s32.totalorder %s1039_s24, 4   ;;  %s1161_s18 = smov %s973_s19 }
 0x238   : > { %s1162_s19 = smov %s977_s20  ;;  %s1163_s20 = smov %s1050_s27 }
 0x239   : > { %s1164_s21 = smov %s1039_s24  ;;  %17 = sbr.rel (!%p15_p3) target bundleno = 3 (0x3), region = 75 }
 0x240   :  { %658 = vsyncpa [#allocation3], 1 }
 0x241   :  { %660 = vsyncpa [#allocation3 + $0x1], 1 }

</bundles_post_ra>
